<compile_context>
chip_gen: v7x
topology: tpu7x:2x2x1
jax: 0.10.0
libtpu: 0.0.40
codegen_flags: <defaults>
</compile_context>

<pallas_src>
import math

import numpy as np
import jax
import jax.numpy as jnp
from jax.experimental import pallas as pl
from jax.experimental.pallas import tpu as pltpu

_EPS = 1e-5
_N_CONVS = 6          # six k=1/p=1 convs -> length grows by 12 total
_PAD = _N_CONVS       # offset where the raw input sits inside each sample slot
_LANE = 128

# Indices into the packed scalar-parameter vector (lives in SMEM).
(_S_B3, _S_W4, _S_B4, _S_W5, _S_B5, _S_W6, _S_B6,
 _S_G1, _S_BE1, _S_G2, _S_BE2) = range(11)


def upsampling_conv_block_4l(x, params):
    n, c_in, l = x.shape
    l_out = l + 2 * _N_CONVS
    m = n * l_out
    m_pad = max(_LANE, ((m + _LANE - 1) // _LANE) * _LANE)

    # Host-side layout plumbing (cheap): channels-first, (N, L) flattened to lanes.
    x2d = jnp.transpose(x, (1, 0, 2)).reshape(c_in, n * l).astype(jnp.float32)

    # Per-lane "position within its sample" (static); -1 marks dead padding lanes
    # so they fail every validity test and never pollute the BN statistics.
    pos_np = np.arange(m_pad)
    pos_np = np.where(pos_np < m, pos_np % l_out, -1).astype(np.int32)
    pos_host = jnp.asarray(pos_np).reshape(1, m_pad)

    p = params
    scal = jnp.stack([
        p["b3"][0, 0], p["w4"][0, 0], p["b4"][0, 0],
        p["w5"][0, 0], p["b5"][0, 0], p["w6"][0, 0], p["b6"][0, 0],
        p["bn1_g"][0, 0], p["bn1_b"][0, 0],
        p["bn2_g"][0, 0], p["bn2_b"][0, 0],
    ]).astype(jnp.float32)

    def kernel(x_ref, pos_ref, w1_ref, b1_ref, w2_ref, b2_ref, w3_ref, sc_ref,
               o_ref, buf_ref):
        pos = pos_ref[...]                        # (1, m_pad) int32

        # Place the raw input at offset _PAD inside each sample's L_out-wide
        # stretch of a zeroed VMEM work buffer (replaces the host-side jnp.pad).
        buf_ref[...] = jnp.zeros_like(buf_ref)
        for s in range(n):
            buf_ref[:, s * l_out + _PAD: s * l_out + _PAD + l] = (
                x_ref[:, s * l:(s + 1) * l])
        h = buf_ref[...]                          # (c_in, m_pad) f32

        def mask(v, lo, hi):
            return jnp.where((pos >= lo) & (pos < hi), v, 0.0)

        lo, hi = _PAD, _PAD + l                   # valid window per sample

        # conv1 (c_in -> c_out) and conv2 (c_out -> c_out): MXU matmuls.
        lo, hi = lo - 1, hi + 1
        h = mask(jnp.dot(w1_ref[...], h, preferred_element_type=jnp.float32)
                 + b1_ref[...], lo, hi)
        lo, hi = lo - 1, hi + 1
        h = mask(jnp.dot(w2_ref[...], h, preferred_element_type=jnp.float32)
                 + b2_ref[...], lo, hi)

        # conv3 (c_out -> 1) + conv4 (1 -> 1) folded with a two-level edge mask:
        #   [lo3, hi3): w4*(w3 @ h + b3) + b4   (h == 0 at conv3's new edges)
        #   conv4-edge ring: b4 ; outside: 0.
        t = (jnp.dot(w3_ref[...], h, preferred_element_type=jnp.float32)
             + sc_ref[_S_B3])
        core = t * sc_ref[_S_W4] + sc_ref[_S_B4]
        lo3, hi3 = lo - 1, hi + 1
        lo, hi = lo3 - 1, hi3 + 1
        h = jnp.where((pos >= lo3) & (pos < hi3), core,
                      jnp.where((pos >= lo) & (pos < hi), sc_ref[_S_B4], 0.0))

        def bn_swish(u, g, be, lo, hi):
            # BatchNorm1d(1), train-mode batch stats, one pass (sum + sumsq),
            # then Swish with the EUP-approx sigmoid. `u` is 0 outside [lo, hi).
            cnt = float(n * (hi - lo))
            ssum = jnp.sum(u)
            ssq = jnp.sum(u * u)
            mean = ssum / cnt
            var = jnp.maximum(ssq / cnt - mean * mean, 0.0)
            y = (u - mean) * (jax.lax.rsqrt(var + _EPS) * g) + be
            y = y * pl.reciprocal(1.0 + jnp.exp(-y), approx=True)  # x*sigmoid(x)
            return mask(y, lo, hi)

        h = bn_swish(h, sc_ref[_S_G1], sc_ref[_S_BE1], lo, hi)

        # conv5 + conv6 folded scalar affine, again with a two-level edge mask.
        core = (h * (sc_ref[_S_W6] * sc_ref[_S_W5])
                + (sc_ref[_S_W6] * sc_ref[_S_B5] + sc_ref[_S_B6]))
        lo5, hi5 = lo - 1, hi + 1
        lo, hi = lo5 - 1, hi5 + 1
        h = jnp.where((pos >= lo5) & (pos < hi5), core,
                      jnp.where((pos >= lo) & (pos < hi), sc_ref[_S_B6], 0.0))

        h = bn_swish(h, sc_ref[_S_G2], sc_ref[_S_BE2], lo, hi)  # lo==0, hi==l_out
        o_ref[...] = h.astype(o_ref.dtype)        # (1, m_pad): lane-dense store

    vmem = pl.BlockSpec(memory_space=pltpu.MemorySpace.VMEM)
    smem = pl.BlockSpec(memory_space=pltpu.MemorySpace.SMEM)
    out = pl.pallas_call(
        kernel,
        out_shape=jax.ShapeDtypeStruct((1, m_pad), jnp.float32),
        in_specs=[vmem, vmem, vmem, vmem, vmem, vmem, vmem, smem],
        out_specs=vmem,
        scratch_shapes=[pltpu.VMEM((c_in, m_pad), jnp.float32)],
    )(x2d, pos_host, p["w1"], p["b1"], p["w2"], p["b2"], p["w3"], scal)

    # Strip lane padding and restore the PyTorch NCL output layout (cheap).
    return out[0, :m].reshape(n, l_out)[:, None, :]


def init_params(key, in_channel, out_channel):
    # Deterministic synthetic init (mimics PyTorch Conv1d's fan-in scaling).
    ks = jax.random.split(key, 12)

    def conv_init(kw, kb, c_out, c_in):
        bound = 1.0 / math.sqrt(c_in)  # kernel_size = 1 -> fan_in = c_in
        w = jax.random.uniform(kw, (c_out, c_in), jnp.float32, -bound, bound)
        b = jax.random.uniform(kb, (c_out, 1), jnp.float32, -bound, bound)
        return w, b

    w1, b1 = conv_init(ks[0], ks[1], out_channel, in_channel)
    w2, b2 = conv_init(ks[2], ks[3], out_channel, out_channel)
    w3, b3 = conv_init(ks[4], ks[5], 1, out_channel)
    w4, b4 = conv_init(ks[6], ks[7], 1, 1)
    w5, b5 = conv_init(ks[8], ks[9], 1, 1)
    w6, b6 = conv_init(ks[10], ks[11], 1, 1)
    return {
        "w1": w1, "b1": b1, "w2": w2, "b2": b2, "w3": w3, "b3": b3,
        "w4": w4, "b4": b4,
        "bn1_g": jnp.ones((1, 1), jnp.float32),
        "bn1_b": jnp.zeros((1, 1), jnp.float32),
        "w5": w5, "b5": b5, "w6": w6, "b6": b6,
        "bn2_g": jnp.ones((1, 1), jnp.float32),
        "bn2_b": jnp.zeros((1, 1), jnp.float32),
    }


def ref_forward(x, p):
    # Pure-JAX reference mirroring the PyTorch module semantics (exact f32:
    # the tiny channel contraction is done with elementwise ops, not a dot).
    def conv(h, w, b):
        hp = jnp.pad(h, ((0, 0), (0, 0), (1, 1)))
        y = jnp.sum(w[None, :, :, None] * hp[:, None, :, :], axis=2)
        return y + b[None, :, :]

    def bn_swish(h, g, bt):
        mean = jnp.mean(h, axis=(0, 2), keepdims=True)
        var = jnp.mean(jnp.square(h - mean), axis=(0, 2), keepdims=True)
        y = (h - mean) / jnp.sqrt(var + _EPS) * g[None, :, :] + bt[None, :, :]
        return y * jax.nn.sigmoid(y)

    h = conv(x, p["w1"], p["b1"])
    h = conv(h, p["w2"], p["b2"])
    h = conv(h, p["w3"], p["b3"])
    h = conv(h, p["w4"], p["b4"])
    h = bn_swish(h, p["bn1_g"], p["bn1_b"])
    h = conv(h, p["w5"], p["b5"])
    h = conv(h, p["w6"], p["b6"])
    h = bn_swish(h, p["bn2_g"], p["bn2_b"])
    return h


if __name__ == "__main__":
    key = jax.random.PRNGKey(0)
    k_x, k_p = jax.random.split(key)
    N, C_IN, C_OUT, L = 2, 4, 8, 16

    x = jax.random.normal(k_x, (N, C_IN, L), jnp.float32)
    params = init_params(k_p, C_IN, C_OUT)

    fwd = jax.jit(upsampling_conv_block_4l)
    out = jax.block_until_ready(fwd(x, params))
    ref = jax.block_until_ready(ref_forward(x, params))

    assert out.shape == (N, 1, L + 12), out.shape
    # 2e-3 tolerance: the Swish sigmoid uses the approximate EUP reciprocal.
    np.testing.assert_allclose(np.asarray(out), np.asarray(ref), rtol=2e-3, atol=2e-3)
    print("KERNEL_OK")
</pallas_src>

<mosaic_0001>
module attributes {stable_mosaic.version = 11 : i64} {
  func.func @kernel(%arg0: memref<4x32xf32, #tpu.memory_space<vmem>>, %arg1: memref<1x128xi32, #tpu.memory_space<vmem>>, %arg2: memref<8x4xf32, #tpu.memory_space<vmem>>, %arg3: memref<8x1xf32, #tpu.memory_space<vmem>>, %arg4: memref<8x8xf32, #tpu.memory_space<vmem>>, %arg5: memref<8x1xf32, #tpu.memory_space<vmem>>, %arg6: memref<1x8xf32, #tpu.memory_space<vmem>>, %arg7: memref<11xf32, #tpu.memory_space<smem>>, %arg8: memref<1x128xf32, #tpu.memory_space<vmem>>, %arg9: memref<4x128xf32, #tpu.memory_space<vmem>>) attributes {dimension_semantics = [], scalar_prefetch = 0 : i64, scratch_operands = 1 : i64, tpu.core_type = #tpu.core_type<tc>} {
    %c0 = arith.constant 0 : index
    %c0_0 = arith.constant 0 : index
    %0 = vector.load %arg1[%c0, %c0_0] : memref<1x128xi32, #tpu.memory_space<vmem>>, vector<1x128xi32>
    %cst = arith.constant 0.000000e+00 : f32
    %1 = vector.broadcast %cst : f32 to vector<4x128xf32>
    %c0_1 = arith.constant 0 : index
    %c0_2 = arith.constant 0 : index
    %2 = vector.load %arg9[%c0_1, %c0_2] : memref<4x128xf32, #tpu.memory_space<vmem>>, vector<4x128xf32>
    tpu.vector_store %arg9[%c0_1, %c0_2], %1 {strides = array<i32>} : memref<4x128xf32, #tpu.memory_space<vmem>>, vector<4x128xf32>,
    %c0_3 = arith.constant 0 : index
    %c0_4 = arith.constant 0 : index
    %3 = vector.load %arg0[%c0_3, %c0_4] : memref<4x32xf32, #tpu.memory_space<vmem>>, vector<4x16xf32>
    %c0_5 = arith.constant 0 : index
    %c6 = arith.constant 6 : index
    %4 = vector.load %arg9[%c0_5, %c6] : memref<4x128xf32, #tpu.memory_space<vmem>>, vector<4x16xf32>
    tpu.vector_store %arg9[%c0_5, %c6], %3 {strides = array<i32>} : memref<4x128xf32, #tpu.memory_space<vmem>>, vector<4x16xf32>,
    %c0_6 = arith.constant 0 : index
    %c16 = arith.constant 16 : index
    %5 = vector.load %arg0[%c0_6, %c16] : memref<4x32xf32, #tpu.memory_space<vmem>>, vector<4x16xf32>
    %c0_7 = arith.constant 0 : index
    %c34 = arith.constant 34 : index
    %6 = vector.load %arg9[%c0_7, %c34] : memref<4x128xf32, #tpu.memory_space<vmem>>, vector<4x16xf32>
    tpu.vector_store %arg9[%c0_7, %c34], %5 {strides = array<i32>} : memref<4x128xf32, #tpu.memory_space<vmem>>, vector<4x16xf32>,
    %c0_8 = arith.constant 0 : index
    %c0_9 = arith.constant 0 : index
    %7 = vector.load %arg9[%c0_8, %c0_9] : memref<4x128xf32, #tpu.memory_space<vmem>>, vector<4x128xf32>
    %c0_10 = arith.constant 0 : index
    %c0_11 = arith.constant 0 : index
    %8 = vector.load %arg2[%c0_10, %c0_11] : memref<8x4xf32, #tpu.memory_space<vmem>>, vector<8x4xf32>
    %cst_12 = arith.constant dense<0.000000e+00> : vector<8x128xf32>
    %9 = tpu.matmul %8, %7, %cst_12 {dimension_numbers = #tpu.dot_dimension_numbers<[1], [0], [0], [1], [0, 0, 1, 1], [], []>} : vector<8x4xf32>, vector<4x128xf32>, vector<8x128xf32> -> vector<8x128xf32>
    %c0_13 = arith.constant 0 : index
    %c0_14 = arith.constant 0 : index
    %10 = vector.load %arg3[%c0_13, %c0_14] : memref<8x1xf32, #tpu.memory_space<vmem>>, vector<8x1xf32>
    %11 = vector.broadcast %10 : vector<8x1xf32> to vector<8x128xf32>
    %12 = arith.addf %9, %11 : vector<8x128xf32>
    %c5_i32 = arith.constant 5 : i32
    %13 = vector.broadcast %c5_i32 : i32 to vector<1x128xi32>
    %14 = arith.cmpi sge, %0, %13 : vector<1x128xi32>
    %c23_i32 = arith.constant 23 : i32
    %15 = vector.broadcast %c23_i32 : i32 to vector<1x128xi32>
    %16 = arith.cmpi slt, %0, %15 : vector<1x128xi32>
    %17 = arith.andi %14, %16 : vector<1x128xi1>
    %cst_15 = arith.constant 0.000000e+00 : f32
    %18 = vector.shape_cast %17 : vector<1x128xi1> to vector<1x128xi1>
    %19 = vector.broadcast %18 : vector<1x128xi1> to vector<8x128xi1>
    %20 = vector.broadcast %cst_15 : f32 to vector<8x128xf32>
    %21 = arith.select %19, %12, %20 : vector<8x128xi1>, vector<8x128xf32>
    %c0_16 = arith.constant 0 : index
    %c0_17 = arith.constant 0 : index
    %22 = vector.load %arg4[%c0_16, %c0_17] : memref<8x8xf32, #tpu.memory_space<vmem>>, vector<8x8xf32>
    %cst_18 = arith.constant dense<0.000000e+00> : vector<8x128xf32>
    %23 = tpu.matmul %22, %21, %cst_18 {dimension_numbers = #tpu.dot_dimension_numbers<[1], [0], [0], [1], [0, 0, 1, 1], [], []>} : vector<8x8xf32>, vector<8x128xf32>, vector<8x128xf32> -> vector<8x128xf32>
    %c0_19 = arith.constant 0 : index
    %c0_20 = arith.constant 0 : index
    %24 = vector.load %arg5[%c0_19, %c0_20] : memref<8x1xf32, #tpu.memory_space<vmem>>, vector<8x1xf32>
    %25 = vector.broadcast %24 : vector<8x1xf32> to vector<8x128xf32>
    %26 = arith.addf %23, %25 : vector<8x128xf32>
    %c4_i32 = arith.constant 4 : i32
    %27 = vector.broadcast %c4_i32 : i32 to vector<1x128xi32>
    %28 = arith.cmpi sge, %0, %27 : vector<1x128xi32>
    %c24_i32 = arith.constant 24 : i32
    %29 = vector.broadcast %c24_i32 : i32 to vector<1x128xi32>
    %30 = arith.cmpi slt, %0, %29 : vector<1x128xi32>
    %31 = arith.andi %28, %30 : vector<1x128xi1>
    %cst_21 = arith.constant 0.000000e+00 : f32
    %32 = vector.shape_cast %31 : vector<1x128xi1> to vector<1x128xi1>
    %33 = vector.broadcast %32 : vector<1x128xi1> to vector<8x128xi1>
    %34 = vector.broadcast %cst_21 : f32 to vector<8x128xf32>
    %35 = arith.select %33, %26, %34 : vector<8x128xi1>, vector<8x128xf32>
    %c0_22 = arith.constant 0 : index
    %c0_23 = arith.constant 0 : index
    %36 = vector.load %arg6[%c0_22, %c0_23] : memref<1x8xf32, #tpu.memory_space<vmem>>, vector<1x8xf32>
    %cst_24 = arith.constant dense<0.000000e+00> : vector<1x128xf32>
    %37 = tpu.matmul %36, %35, %cst_24 {dimension_numbers = #tpu.dot_dimension_numbers<[1], [0], [0], [1], [0, 0, 1, 1], [], []>} : vector<1x8xf32>, vector<8x128xf32>, vector<1x128xf32> -> vector<1x128xf32>
    %c0_25 = arith.constant 0 : index
    %38 = memref.load %arg7[%c0_25] : memref<11xf32, #tpu.memory_space<smem>>
    %39 = vector.broadcast %38 : f32 to vector<1x128xf32>
    %40 = arith.addf %37, %39 : vector<1x128xf32>
    %c1 = arith.constant 1 : index
    %41 = memref.load %arg7[%c1] : memref<11xf32, #tpu.memory_space<smem>>
    %42 = vector.broadcast %41 : f32 to vector<1x128xf32>
    %43 = arith.mulf %40, %42 : vector<1x128xf32>
    %c2 = arith.constant 2 : index
    %44 = memref.load %arg7[%c2] : memref<11xf32, #tpu.memory_space<smem>>
    %45 = vector.broadcast %44 : f32 to vector<1x128xf32>
    %46 = arith.addf %43, %45 : vector<1x128xf32>
    %c3_i32 = arith.constant 3 : i32
    %47 = vector.broadcast %c3_i32 : i32 to vector<1x128xi32>
    %48 = arith.cmpi sge, %0, %47 : vector<1x128xi32>
    %c25_i32 = arith.constant 25 : i32
    %49 = vector.broadcast %c25_i32 : i32 to vector<1x128xi32>
    %50 = arith.cmpi slt, %0, %49 : vector<1x128xi32>
    %51 = arith.andi %48, %50 : vector<1x128xi1>
    %c2_i32 = arith.constant 2 : i32
    %52 = vector.broadcast %c2_i32 : i32 to vector<1x128xi32>
    %53 = arith.cmpi sge, %0, %52 : vector<1x128xi32>
    %c26_i32 = arith.constant 26 : i32
    %54 = vector.broadcast %c26_i32 : i32 to vector<1x128xi32>
    %55 = arith.cmpi slt, %0, %54 : vector<1x128xi32>
    %56 = arith.andi %53, %55 : vector<1x128xi1>
    %c2_26 = arith.constant 2 : index
    %57 = memref.load %arg7[%c2_26] : memref<11xf32, #tpu.memory_space<smem>>
    %cst_27 = arith.constant 0.000000e+00 : f32
    %58 = vector.broadcast %57 : f32 to vector<1x128xf32>
    %59 = vector.broadcast %cst_27 : f32 to vector<1x128xf32>
    %60 = arith.select %56, %58, %59 : vector<1x128xi1>, vector<1x128xf32>
    %61 = arith.select %51, %46, %60 : vector<1x128xi1>, vector<1x128xf32>
    %c7 = arith.constant 7 : index
    %62 = memref.load %arg7[%c7] : memref<11xf32, #tpu.memory_space<smem>>
    %c8 = arith.constant 8 : index
    %63 = memref.load %arg7[%c8] : memref<11xf32, #tpu.memory_space<smem>>
    %64 = vector.shape_cast %61 : vector<1x128xf32> to vector<1x1x128xf32>
    %cst_28 = arith.constant dense<0.000000e+00> : vector<1xf32>
    %65 = vector.multi_reduction <add>, %64, %cst_28 [1, 2] : vector<1x1x128xf32> to vector<1xf32>
    %66 = vector.shape_cast %65 : vector<1xf32> to vector<1x1x1xf32>
    %67 = vector.extract %66[0, 0, 0] : f32 from vector<1x1x1xf32>
    %68 = arith.mulf %61, %61 : vector<1x128xf32>
    %69 = vector.shape_cast %68 : vector<1x128xf32> to vector<1x1x128xf32>
    %cst_29 = arith.constant dense<0.000000e+00> : vector<1xf32>
    %70 = vector.multi_reduction <add>, %69, %cst_29 [1, 2] : vector<1x1x128xf32> to vector<1xf32>
    %71 = vector.shape_cast %70 : vector<1xf32> to vector<1x1x1xf32>
    %72 = vector.extract %71[0, 0, 0] : f32 from vector<1x1x1xf32>
    %cst_30 = arith.constant 4.800000e+01 : f32
    %73 = arith.divf %67, %cst_30 : f32
    %cst_31 = arith.constant 4.800000e+01 : f32
    %74 = arith.divf %72, %cst_31 : f32
    %75 = arith.mulf %73, %73 : f32
    %76 = arith.subf %74, %75 : f32
    %cst_32 = arith.constant 0.000000e+00 : f32
    %77 = arith.maximumf %76, %cst_32 : f32
    %78 = vector.broadcast %73 : f32 to vector<1x128xf32>
    %79 = arith.subf %61, %78 : vector<1x128xf32>
    %cst_33 = arith.constant 9.99999974E-6 : f32
    %80 = arith.addf %77, %cst_33 : f32
    %81 = math.rsqrt %80 : f32
    %82 = arith.mulf %81, %62 : f32
    %83 = vector.broadcast %82 : f32 to vector<1x128xf32>
    %84 = arith.mulf %79, %83 : vector<1x128xf32>
    %85 = vector.broadcast %63 : f32 to vector<1x128xf32>
    %86 = arith.addf %84, %85 : vector<1x128xf32>
    %cst_34 = arith.constant 0.000000e+00 : f32
    %87 = vector.broadcast %cst_34 : f32 to vector<1x128xf32>
    %88 = arith.subf %87, %86 : vector<1x128xf32>
    %89 = math.exp %88 : vector<1x128xf32>
    %cst_35 = arith.constant 1.000000e+00 : f32
    %90 = vector.broadcast %cst_35 : f32 to vector<1x128xf32>
    %91 = arith.addf %90, %89 : vector<1x128xf32>
    %92 = tpu.reciprocal %91 {approx = true} : vector<1x128xf32> -> vector<1x128xf32>
    %93 = arith.mulf %86, %92 : vector<1x128xf32>
    %c2_i32_36 = arith.constant 2 : i32
    %94 = vector.broadcast %c2_i32_36 : i32 to vector<1x128xi32>
    %95 = arith.cmpi sge, %0, %94 : vector<1x128xi32>
    %c26_i32_37 = arith.constant 26 : i32
    %96 = vector.broadcast %c26_i32_37 : i32 to vector<1x128xi32>
    %97 = arith.cmpi slt, %0, %96 : vector<1x128xi32>
    %98 = arith.andi %95, %97 : vector<1x128xi1>
    %cst_38 = arith.constant 0.000000e+00 : f32
    %99 = vector.broadcast %cst_38 : f32 to vector<1x128xf32>
    %100 = arith.select %98, %93, %99 : vector<1x128xi1>, vector<1x128xf32>
    %c5 = arith.constant 5 : index
    %101 = memref.load %arg7[%c5] : memref<11xf32, #tpu.memory_space<smem>>
    %c3 = arith.constant 3 : index
    %102 = memref.load %arg7[%c3] : memref<11xf32, #tpu.memory_space<smem>>
    %103 = arith.mulf %101, %102 : f32
    %104 = vector.broadcast %103 : f32 to vector<1x128xf32>
    %105 = arith.mulf %100, %104 : vector<1x128xf32>
    %c5_39 = arith.constant 5 : index
    %106 = memref.load %arg7[%c5_39] : memref<11xf32, #tpu.memory_space<smem>>
    %c4 = arith.constant 4 : index
    %107 = memref.load %arg7[%c4] : memref<11xf32, #tpu.memory_space<smem>>
    %108 = arith.mulf %106, %107 : f32
    %c6_40 = arith.constant 6 : index
    %109 = memref.load %arg7[%c6_40] : memref<11xf32, #tpu.memory_space<smem>>
    %110 = arith.addf %108, %109 : f32
    %111 = vector.broadcast %110 : f32 to vector<1x128xf32>
    %112 = arith.addf %105, %111 : vector<1x128xf32>
    %c1_i32 = arith.constant 1 : i32
    %113 = vector.broadcast %c1_i32 : i32 to vector<1x128xi32>
    %114 = arith.cmpi sge, %0, %113 : vector<1x128xi32>
    %c27_i32 = arith.constant 27 : i32
    %115 = vector.broadcast %c27_i32 : i32 to vector<1x128xi32>
    %116 = arith.cmpi slt, %0, %115 : vector<1x128xi32>
    %117 = arith.andi %114, %116 : vector<1x128xi1>
    %c0_i32 = arith.constant 0 : i32
    %118 = vector.broadcast %c0_i32 : i32 to vector<1x128xi32>
    %119 = arith.cmpi sge, %0, %118 : vector<1x128xi32>
    %c28_i32 = arith.constant 28 : i32
    %120 = vector.broadcast %c28_i32 : i32 to vector<1x128xi32>
    %121 = arith.cmpi slt, %0, %120 : vector<1x128xi32>
    %122 = arith.andi %119, %121 : vector<1x128xi1>
    %c6_41 = arith.constant 6 : index
    %123 = memref.load %arg7[%c6_41] : memref<11xf32, #tpu.memory_space<smem>>
    %cst_42 = arith.constant 0.000000e+00 : f32
    %124 = vector.broadcast %123 : f32 to vector<1x128xf32>
    %125 = vector.broadcast %cst_42 : f32 to vector<1x128xf32>
    %126 = arith.select %122, %124, %125 : vector<1x128xi1>, vector<1x128xf32>
    %127 = arith.select %117, %112, %126 : vector<1x128xi1>, vector<1x128xf32>
    %c9 = arith.constant 9 : index
    %128 = memref.load %arg7[%c9] : memref<11xf32, #tpu.memory_space<smem>>
    %c10 = arith.constant 10 : index
    %129 = memref.load %arg7[%c10] : memref<11xf32, #tpu.memory_space<smem>>
    %130 = vector.shape_cast %127 : vector<1x128xf32> to vector<1x1x128xf32>
    %cst_43 = arith.constant dense<0.000000e+00> : vector<1xf32>
    %131 = vector.multi_reduction <add>, %130, %cst_43 [1, 2] : vector<1x1x128xf32> to vector<1xf32>
    %132 = vector.shape_cast %131 : vector<1xf32> to vector<1x1x1xf32>
    %133 = vector.extract %132[0, 0, 0] : f32 from vector<1x1x1xf32>
    %134 = arith.mulf %127, %127 : vector<1x128xf32>
    %135 = vector.shape_cast %134 : vector<1x128xf32> to vector<1x1x128xf32>
    %cst_44 = arith.constant dense<0.000000e+00> : vector<1xf32>
    %136 = vector.multi_reduction <add>, %135, %cst_44 [1, 2] : vector<1x1x128xf32> to vector<1xf32>
    %137 = vector.shape_cast %136 : vector<1xf32> to vector<1x1x1xf32>
    %138 = vector.extract %137[0, 0, 0] : f32 from vector<1x1x1xf32>
    %cst_45 = arith.constant 5.600000e+01 : f32
    %139 = arith.divf %133, %cst_45 : f32
    %cst_46 = arith.constant 5.600000e+01 : f32
    %140 = arith.divf %138, %cst_46 : f32
    %141 = arith.mulf %139, %139 : f32
    %142 = arith.subf %140, %141 : f32
    %cst_47 = arith.constant 0.000000e+00 : f32
    %143 = arith.maximumf %142, %cst_47 : f32
    %144 = vector.broadcast %139 : f32 to vector<1x128xf32>
    %145 = arith.subf %127, %144 : vector<1x128xf32>
    %cst_48 = arith.constant 9.99999974E-6 : f32
    %146 = arith.addf %143, %cst_48 : f32
    %147 = math.rsqrt %146 : f32
    %148 = arith.mulf %147, %128 : f32
    %149 = vector.broadcast %148 : f32 to vector<1x128xf32>
    %150 = arith.mulf %145, %149 : vector<1x128xf32>
    %151 = vector.broadcast %129 : f32 to vector<1x128xf32>
    %152 = arith.addf %150, %151 : vector<1x128xf32>
    %cst_49 = arith.constant 0.000000e+00 : f32
    %153 = vector.broadcast %cst_49 : f32 to vector<1x128xf32>
    %154 = arith.subf %153, %152 : vector<1x128xf32>
    %155 = math.exp %154 : vector<1x128xf32>
    %cst_50 = arith.constant 1.000000e+00 : f32
    %156 = vector.broadcast %cst_50 : f32 to vector<1x128xf32>
    %157 = arith.addf %156, %155 : vector<1x128xf32>
    %158 = tpu.reciprocal %157 {approx = true} : vector<1x128xf32> -> vector<1x128xf32>
    %159 = arith.mulf %152, %158 : vector<1x128xf32>
    %c0_i32_51 = arith.constant 0 : i32
    %160 = vector.broadcast %c0_i32_51 : i32 to vector<1x128xi32>
    %161 = arith.cmpi sge, %0, %160 : vector<1x128xi32>
    %c28_i32_52 = arith.constant 28 : i32
    %162 = vector.broadcast %c28_i32_52 : i32 to vector<1x128xi32>
    %163 = arith.cmpi slt, %0, %162 : vector<1x128xi32>
    %164 = arith.andi %161, %163 : vector<1x128xi1>
    %cst_53 = arith.constant 0.000000e+00 : f32
    %165 = vector.broadcast %cst_53 : f32 to vector<1x128xf32>
    %166 = arith.select %164, %159, %165 : vector<1x128xi1>, vector<1x128xf32>
    %c0_54 = arith.constant 0 : index
    %c0_55 = arith.constant 0 : index
    %167 = vector.load %arg8[%c0_54, %c0_55] : memref<1x128xf32, #tpu.memory_space<vmem>>, vector<1x128xf32>
    tpu.vector_store %arg8[%c0_54, %c0_55], %166 {strides = array<i32>} : memref<1x128xf32, #tpu.memory_space<vmem>>, vector<1x128xf32>,
    return
  }
}

</mosaic_0001>

<bundles_post_ra>
// kernel: squeeze.23
= control target key start
LH: loop header
LB: loop body
LE: loop exit
PB: predicated region body
PF: predicated region fallthrough
CT: control target
= control target key end

     0   :  { %s85_s0 = inlined_call_operand.vmem [shape: f32[56], index: 0, kind: input, shape index: {}]   ;;  %s86_s1 = inlined_call_operand.hbm [shape: f32[2,1,28], index: 1, kind: output, shape index: {}]  }
   0x1   :  { %v5_v0 = vld [vmem:[%s85_s0] sm:$0x1] }
   0x2   :  { %2 = vsyncpa [#allocation1], 0  ;;  %6 = vst [vmem:[#allocation3] sm:$0x1] %v5_v0  ;;  %vm8_vm0 = vcmask 228352   ;;  %s58_s0 = smov 100  }
   0x3   :  { %s59_s8 = smov [#allocation0]  }
   0x4   :  { %s26_s9 = sshll.u32 %s59_s8, 4  ;;  %s27_s9 = int_to_ptr.vmem [resolvable:$true] %s26_s9 }
   0x5   :  { %s34_s10 = scalar_lea.vmem %s27_s9, 32  ;;  %p39_p1 = scmp.lt.s32.totalorder %s27_s9, %s27_s9 }
   0x6   :  { %p35_p0 = scmp.ne.s32.totalorder %s27_s9, %s34_s10  ;;  %p40_p2 = scmp.lt.s32.totalorder %s34_s10, %s34_s10 }
   0x8   :  { %p41_p3 = por %p40_p2, %p39_p1 }
   0x9   :  { %v10_v1 = vld [vmem:[#allocation3] sm:$0x1]  }
   0xa   :  { %v7_v2 = vld [vmem:[#allocation3] sm:$0x1]   ;;  %11 = vrot.lane.b32.xlu0 %v10_v1, %s58_s0  ;;  %p42_p4 = pnand %p41_p3, %p35_p0 }
   0xb   :  { %9 = vst.msk [vmem:[#allocation2] sm:$0x1] %vm8_vm0, %v7_v2  }
  0x7c   :  { %v12_v3 = vpop.permute.xlu0 %11  }
  0x7d   :  { %15 = vst.msk [vmem:[#allocation2 + $0x1] sm:$0x1] %vm8_vm0, %v12_v3  }
  0x84   :  { %v19_v4 = vld [vmem:[#allocation2] sm:$0x3] }
  0x85   :  { %21 = vst [vmem:[#allocation0] sm:$0x3] %v19_v4 }
  0x86   :  { %45 = shalt.err (!%p42_p4)
}
  0x87   :  { %s46_s13 = scalar_lea.hbm %s86_s1, 32 }
  0x88   :  { %p47_p5 = scmp.ne.s32.totalorder %s86_s1, %s46_s13  ;;  %p50_p6 = scmp.lt.u32.totalorder %s46_s13, %s86_s1 }
  0x8a   :  { %p52_p7 = pnand %p50_p6, %p47_p5 }
  0x8c   :  { %55 = shalt.err (!%p52_p7)
}
  0x8d   :  { %29 = dma.vmem_to_hbm [thread:$0]  %s27_s9, 32, %s86_s1, [#allocation1]  }
  0x8e   :  { %56 = dma.done.wait [#allocation1], 32  }
  0x8f   :  { %57 = vsyncadd [#allocation1], 4294967264 }
  0x90   :  { %31 = vsyncpa [#allocation1], 1 }

// kernel: upsampling_conv_block_4l.1
= control target key start
LH: loop header
LB: loop body
LE: loop exit
PB: predicated region body
PF: predicated region fallthrough
CT: control target
= control target key end

     0   :  { %13 = vsyncpa [#allocation4], 0  ;;  %s667_s0 = inlined_call_operand.vmem [shape: f32[4,32], index: 0, kind: input, shape index: {}]   ;;  %s668_s1 = inlined_call_operand.vmem [shape: s32[1,128], index: 1, kind: input, shape index: {}]   ;;  %s669_s2 = inlined_call_operand.vmem [shape: f32[8,4], index: 2, kind: input, shape index: {}]   ;;  %s670_s3 = inlined_call_operand.vmem [shape: f32[8,1], index: 3, kind: input, shape index: {}]   ;;  %s671_s4 = inlined_call_operand.vmem [shape: f32[8,8], index: 4, kind: input, shape index: {}]   ;;  %s672_s5 = inlined_call_operand.vmem [shape: f32[8,1], index: 5, kind: input, shape index: {}]   ;;  %s673_s6 = inlined_call_operand.vmem [shape: f32[1,8], index: 6, kind: input, shape index: {}]   ;;  %s674_s7 = inlined_call_operand.vmem [shape: f32[11], index: 7, kind: input, shape index: {}]   ;;  %s675_s8 = inlined_call_operand.vmem [shape: f32[1,128], index: 8, kind: output, shape index: {}]  }
   0x1   :  { %s34_s29 = sshll.u32 %s674_s7, 4  ;;  %s35_s29 = int_to_ptr.vmem [resolvable:$true] %s34_s29 }
   0x2   :  { %s532_s30 = scalar_lea.vmem %s35_s29, 16  ;;  %p537_p1 = scmp.lt.s32.totalorder %s35_s29, %s35_s29 }
   0x3   :  { %p533_p0 = scmp.ne.s32.totalorder %s35_s29, %s532_s30  ;;  %p538_p2 = scmp.lt.s32.totalorder %s532_s30, %s532_s30 }
   0x5   :  { %p539_p3 = por %p538_p2, %p537_p1 }
   0x7   :  { %p540_p4 = pnand %p539_p3, %p533_p0 }
   0x9   :  { %543 = shalt.err (!%p540_p4)
}
   0xa   :  { %s546_s9 = smov [#allocation3]  }
   0xb   :  { %37 = dma.vmem_to_smem %s35_s29, 16, %s546_s9, [#allocation4]  }
   0xc   :  { %544 = dma.done.wait [#allocation4], 16  }
   0xd   :  { %545 = vsyncadd [#allocation4], 4294967280 }
   0xe   :  { %41 = sfence }
   0xf   :  { %v44_v0 = vld [vmem:[%s667_s0] sm:$0xf]  ;;  %s547_s12 = smov 6   ;;  %v548_v3 = vmov 0.0   ;;  %vm549_vm0 = vmmov 0   ;;  %v550_v4 = vmov 0   ;;  %v148_v11 = vlaneseq }
  0x10   :  { %46 = vrot.lane.b32.xlu0 %v44_v0, %s547_s12  ;;  %v60_v1 = vld [vmem:[%s670_s3] sm:$0xff]  ;;  %43 = vst [vmem:[#allocation2] sm:$0xf] %v548_v3  ;;  %484 = vmatprep.subr.mxu0 %v548_v3  ;;  %s551_s16 = smov 18   ;;  %vm49_vm1 = vcmask 175152   ;;  %vm56_vm2 = vcmask 404752  }
  0x11   :  { %v51_v2 = vld [vmem:[%s667_s0] sm:$0xf]  ;;  %489 = vmatprep.subr.mxu1 %v548_v3  ;;  %486 = vmatprep.mubr.msk.f32.mxu0 %vm549_vm0, %v548_v3  ;;  %vm70_vm3 = vcmask 1043456   ;;  %vm66_vm4 = vcmask 31744   ;;  %v149_v12 = vshrl.u32 %v148_v11, 7  ;;  %vm161_vm9 = vcmask 64512  }
  0x12   :  { %518 = vset.pattern.permute.xlu1 %v550_v4  ;;  %491 = vmatprep.mubr.msk.f32.mxu1 %vm549_vm0, %v548_v3  ;;  %v155_v5 = vld [vmem:[%s672_s5] sm:$0xff]  ;;  %s468_s22 = sld [smem:[#allocation3 + $0x1]]  ;;  %s469_s23 = sld [smem:[#allocation3 + $0x2]] }
  0x13   :  { %63 = vperm.xlu1 %518, %v60_v1   ;;  %519 = vset.pattern.permute.xlu0 %v550_v4  ;;  %v59_v8 = vld [vmem:[%s669_s2] sm:$0xff]  ;;  %v150_v13 = vsub.s32 0, %v149_v12  ;;  %s552_s29 = smov 0.0   ;;  %s470_s10 = sld [smem:[#allocation3 + $0x7]] }
  0x14   :  { %53 = vrot.lane.b32.xlu0 %v51_v2, %s551_s16  ;;  %v622_v10 = vld [vmem:[%s668_s1] sm:$0x1]  ;;  %s471_s11 = sld [smem:[#allocation3 + $0x8]]  ;;  %s472_s13 = sld [smem:[#allocation3 + $0x5]] }
  0x15   :  { %vm144_vm5 = vcmp.ge.s32.totalorder %v622_v10, 5  ;;  %vm145_vm6 = vcmp.lt.s32.totalorder %v622_v10, 23  ;;  %v154_v20 = vld [vmem:[%s671_s4] sm:$0xff]  ;;  %vm235_vm10 = vcmp.ge.s32.totalorder %v622_v10, 4  ;;  %vm236_vm11 = vcmp.lt.s32.totalorder %v622_v10, 24  ;;  %s246_s4 = sld [smem:[#allocation3]] }
  0x16   :  { %vm146_vm7 = vmand %vm144_vm5, %vm145_vm6  ;;  %v245_v27 = vld [vmem:[%s673_s6] sm:$0x1]  ;;  %vm330_vm14 = vcmp.ge.s32.totalorder %v622_v10, 2  ;;  %vm331_vm15 = vcmp.lt.s32.totalorder %v622_v10, 26  ;;  %s474_s14 = sld [smem:[#allocation3 + $0x4]]  ;;  %s473_s15 = sld [smem:[#allocation3 + $0x3]] }
  0x17   :  { %158 = vperm.xlu1 %518, %v155_v5   ;;  %v147_v14 = vsel %vm146_vm7, 1, %v550_v4  ;;  %vm237_vm12 = vmand %vm235_vm10, %vm236_vm11  ;;  %s475_s16 = sld [smem:[#allocation3 + $0x6]]  ;;  %vm400_vm5 = vcmp.ge.s32.totalorder %v622_v10, 0  ;;  %vm401_vm6 = vcmp.lt.s32.totalorder %v622_v10, 28  ;;  %vm397_vm7 = vcmp.ge.s32.totalorder %v622_v10, 1 }
  0x18   :  { %v151_v15 = vrot.slane %v147_v14, %v150_v13  ;;  %v238_v21 = vsel %vm237_vm12, 1, %v550_v4  ;;  %v322_v30 = vstv %s468_s22  ;;  %v325_v32 = vstv %s469_s23  ;;  %s476_s22 = sld [smem:[#allocation3 + $0x9]]  ;;  %s477_s23 = sld [smem:[#allocation3 + $0xa]] }
  0x19   :  { %v242_v22 = vrot.slane %v238_v21, %v150_v13 }
  0x1a   :  { %vm152_vm8 = vcmp.eq.s32.totalorder %v151_v15, 1  ;;  %v377_v61 = vstv %s471_s11 }
  0x1b   :  { %vm243_vm13 = vcmp.eq.s32.totalorder %v242_v22, 1  ;;  %v247_v28 = vstv %s246_s4 }
  0x1c   :  { %s392_s17 = smul.f32 %s474_s14, %s472_s13 }
  0x1d   :  { %s388_s3 = smul.f32 %s473_s15, %s472_s13 }
  0x1e   :  { %s394_s0 = sadd.f32 %s475_s16, %s392_s17 }
  0x20   :  { %v395_v11 = vstv %s394_s0 }
  0x82   :  { %v47_v6 = vpop.permute.xlu0 %46 }
  0x83   :  { %50 = vst.msk [vmem:[#allocation2] sm:$0xf] %vm49_vm1, %v47_v6  ;;  %vm328_vm1 = vcmp.lt.s32.totalorder %v622_v10, 25  ;;  %v389_v6 = vstv %s388_s3 }
  0x86   :  { %v54_v7 = vpop.permute.xlu0 %53 }
  0x87   :  { %57 = vst.msk [vmem:[#allocation2] sm:$0xf] %vm56_vm2, %v54_v7  ;;  %vm638_vm2 = vmand %vm330_vm14, %vm331_vm15 }
  0x88   :  { %v333_v36 = vsel %vm638_vm2, %v325_v32, 0.0 }
  0x8e   :  { %v58_v9 = vld [vmem:[#allocation2] sm:$0xf] }
  0x8f   :  { %485 = vmatpush3.msk.msra.mxu0 %vm70_vm3, %v58_v9 }
  0x90   :  { %487 = vmatmul.mubr.msk.f32.vlgmr.msra.gmra.mrb[0].mxu0 %vm66_vm4, %v59_v8  ;;  %494 = vmatprep.subr.mxu0 %v548_v3  ;;  %vm337_vm4 = vcmask 1040384   ;;  %v403_v8 = vstv %s475_s16 }
  0x91   :  { %496 = vmatprep.mubr.msk.f32.mxu0 %vm549_vm0, %v548_v3  ;;  %vm327_vm0 = vcmp.ge.s32.totalorder %v622_v10, 3 }
  0x92   :  { %v64_v16 = vpop.permute.xlu1 %63  ;;  %vm329_vm3 = vmand %vm327_vm0, %vm328_vm1 }
  0x96   :  { %v159_v23 = vpop.permute.xlu1 %158 }
 0x163   :  { %v140_v17 = vpop.f32.mrb[0].mxu0 }
 0x164   :  { %v141_v18 = vadd.f32 %v140_v17, %v64_v16  ;;  %v488_v19 = vpop.f32.mrb[1].mxu0 }
 0x166   :  { %490 = vmatpush3.msk.msra.mxu1 %vm152_vm8, %v141_v18  ;;  %vm398_vm8 = vcmp.lt.s32.totalorder %v622_v10, 27 }
 0x167   :  { %492 = vmatmul.mubr.msk.f32.vlgmr.msra.gmra.mrb[0].mxu1 %vm161_vm9, %v154_v20  ;;  %vm399_vm10 = vmand %vm397_vm7, %vm398_vm8 }
 0x23a   :  { %v231_v24 = vpop.f32.mrb[0].mxu1 }
 0x23b   :  { %v232_v25 = vadd.f32 %v231_v24, %v159_v23  ;;  %v493_v26 = vpop.f32.mrb[1].mxu1 }
 0x23d   :  { %495 = vmatpush3.msk.msra.mxu0 %vm243_vm13, %v232_v25 }
 0x23e   :  { %497 = vmatmul.mubr.msk.f32.vlgmr.msra.gmra.mrb[2].mxu0 %vm161_vm9, %v245_v27  ;;  %vm651_vm9 = vmand %vm400_vm5, %vm401_vm6 }
 0x23f   :  { %v404_v13 = vsel %vm651_vm9, %v403_v8, 0.0 }
 0x311   :  { %v317_v29 = vpop.f32.mrb[2].mxu0 }
 0x312   :  { %v318_v31 = vadd.f32 %v317_v29, %v247_v28  ;;  %v498_v33 = vpop.f32.mrb[3].mxu0 }
 0x314   :  { %v323_v35 = vmul.f32 %v322_v30, %v318_v31 }
 0x316   :  { %v326_v37 = vadd.f32 %v325_v32, %v323_v35 }
 0x318   :  { %v334_v38 = vsel %vm329_vm3, %v326_v37, %v333_v36  ;;  %v447_v37 = vstv %s477_s23 }
 0x319   :  { %v338_v39 = vsel %vm337_vm4, %v334_v38, 0.0  ;;  %v348_v40 = vmul.f32 %v334_v38, %v334_v38 }
 0x31a   :  { %339 = vadd.xlane.f32.xlu0 %v338_v39 }
 0x31b   :  { %v349_v41 = vsel %vm337_vm4, %v348_v40, 0.0 }
 0x31c   :  { %350 = vadd.xlane.f32.xlu1 %v349_v41 }
 0x3a7   :  { %v340_v42 = vpop.xlane.xlu0 %339 }
 0x3a8   :  { %v341_v43 = vrot.slane %v340_v42, 4 }
 0x3a9   :  { %v351_v44 = vpop.xlane.xlu1 %350 }
 0x3aa   :  { %v342_v45 = vadd.f32 %v341_v43, %v340_v42  ;;  %v352_v46 = vrot.slane %v351_v44, 4 }
 0x3ac   :  { %v343_v47 = vrot.slane %v342_v45, 2  ;;  %v353_v48 = vadd.f32 %v352_v46, %v351_v44 }
 0x3ae   :  { %v354_v49 = vrot.slane %v353_v48, 2  ;;  %v344_v50 = vadd.f32 %v343_v47, %v342_v45 }
 0x3b0   :  { %v355_v51 = vadd.f32 %v354_v49, %v353_v48  ;;  %v345_v52 = vrot.slane %v344_v50, 1 }
 0x3b2   :  { %v346_v53 = vadd.f32 %v345_v52, %v344_v50  ;;  %v356_v54 = vrot.slane %v355_v51, 1 }
 0x3b4   :  { %499 = vpush %v346_v53  ;;  %v357_v55 = vadd.f32 %v356_v54, %v355_v51 }
 0x3b6   :  { %501 = vpush %v357_v55 }
 0x3e5   :  { %s500_s6 = spop %499 }
 0x3e6   :  { %s361_s24 = smul.f32 0.020833334, %s500_s6 }
 0x3e7   :  { %s502_s25 = spop %501 }
 0x3e8   :  { %s365_s26 = smul.f32 %s361_s24, %s361_s24  ;;  %v368_v58 = vstv %s361_s24 }
 0x3e9   :  { %s364_s27 = smul.f32 0.020833334, %s502_s25  ;;  %v369_v59 = vsub.f32 %v334_v38, %v368_v58 }
 0x3eb   :  { %s366_s28 = ssub.f32 %s364_s27, %s365_s26 }
 0x3ed   :  { %s367_s30 = smax.f32 %s552_s29, %s366_s28 }
 0x3ee   :  { %s370_s9 = sadd.f32 1e-05, %s367_s30 }
 0x3f0   :  { %v371_v56 = vstv %s370_s9 }
 0x3f1   :  { %520 = vrsqrt.f32 %v371_v56 }
 0x3fb   :  { %v521_v57 = vpop.eup %520 }
 0x3fc   :  { %503 = vpush %v521_v57 }
 0x42d   :  { %s504_s12 = spop %503 }
 0x42e   :  { %s374_s7 = smul.f32 %s504_s12, %s470_s10 }
 0x430   :  { %v375_v60 = vstv %s374_s7 }
 0x431   :  { %v376_v62 = vmul.f32 %v375_v60, %v369_v59 }
 0x433   :  { %v378_v63 = vadd.f32 %v377_v61, %v376_v62 }
 0x435   :  { %v379_v0 = vsub.f32 0.0, %v378_v63 }
 0x437   :  { %v380_v1 = vmul.f32 1.442695, %v379_v0 }
 0x439   :  { %522 = vpow2.f32 %v380_v1 }
 0x443   :  { %v523_v2 = vpop.eup %522 }
 0x444   :  { %v382_v3 = vadd.f32 1.0, %v523_v2 }
 0x446   :  { %524 = vrcp.f32 %v382_v3 }
 0x450   :  { %v525_v4 = vpop.eup %524 }
 0x451   :  { %v384_v5 = vmul.f32 %v525_v4, %v378_v63 }
 0x453   :  { %v385_v9 = vsel %vm638_vm2, %v384_v5, 0.0 }
 0x454   :  { %v390_v12 = vmul.f32 %v389_v6, %v385_v9 }
 0x456   :  { %v396_v14 = vadd.f32 %v395_v11, %v390_v12 }
 0x458   :  { %v405_v15 = vsel %vm399_vm10, %v396_v14, %v404_v13 }
 0x459   :  { %v408_v16 = vsel %vm337_vm4, %v405_v15, 0.0  ;;  %v418_v17 = vmul.f32 %v405_v15, %v405_v15 }
 0x45a   :  { %409 = vadd.xlane.f32.xlu0 %v408_v16 }
 0x45b   :  { %v419_v10 = vsel %vm337_vm4, %v418_v17, 0.0 }
 0x45e   :  { %420 = vadd.xlane.f32.xlu0 %v419_v10 }
 0x4e7   :  { %v410_v18 = vpop.xlane.xlu0 %409 }
 0x4e8   :  { %v411_v19 = vrot.slane %v410_v18, 4 }
 0x4ea   :  { %v412_v20 = vadd.f32 %v411_v19, %v410_v18 }
 0x4eb   :  { %v421_v21 = vpop.xlane.xlu0 %420 }
 0x4ec   :  { %v413_v22 = vrot.slane %v412_v20, 2  ;;  %v422_v23 = vrot.slane %v421_v21, 4 }
 0x4ee   :  { %v423_v24 = vadd.f32 %v422_v23, %v421_v21  ;;  %v414_v25 = vadd.f32 %v413_v22, %v412_v20 }
 0x4f0   :  { %v424_v26 = vrot.slane %v423_v24, 2  ;;  %v415_v27 = vrot.slane %v414_v25, 1 }
 0x4f2   :  { %v425_v28 = vadd.f32 %v424_v26, %v423_v24  ;;  %v416_v29 = vadd.f32 %v415_v27, %v414_v25 }
 0x4f4   :  { %505 = vpush %v416_v29  ;;  %v426_v30 = vrot.slane %v425_v28, 1 }
 0x4f6   :  { %v427_v31 = vadd.f32 %v426_v30, %v425_v28 }
 0x4f8   :  { %507 = vpush %v427_v31 }
 0x525   :  { %s506_s18 = spop %505 }
 0x526   :  { %s431_s5 = smul.f32 0.017857144, %s506_s18 }
 0x528   :  { %s435_s19 = smul.f32 %s431_s5, %s431_s5  ;;  %v438_v34 = vstv %s431_s5 }
 0x529   :  { %s508_s2 = spop %507  ;;  %v439_v35 = vsub.f32 %v405_v15, %v438_v34 }
 0x52a   :  { %s434_s20 = smul.f32 0.017857144, %s508_s2 }
 0x52c   :  { %s436_s1 = ssub.f32 %s434_s20, %s435_s19 }
 0x52e   :  { %s437_s21 = smax.f32 %s552_s29, %s436_s1 }
 0x52f   :  { %s440_s4 = sadd.f32 1e-05, %s437_s21 }
 0x531   :  { %v441_v32 = vstv %s440_s4 }
 0x532   :  { %526 = vrsqrt.f32 %v441_v32 }
 0x53c   :  { %v527_v33 = vpop.eup %526 }
 0x53d   :  { %509 = vpush %v527_v33 }
 0x56e   :  { %s510_s6 = spop %509 }
 0x56f   :  { %s444_s24 = smul.f32 %s510_s6, %s476_s22 }
 0x571   :  { %v445_v36 = vstv %s444_s24 }
 0x572   :  { %v446_v38 = vmul.f32 %v445_v36, %v439_v35 }
 0x574   :  { %v448_v39 = vadd.f32 %v447_v37, %v446_v38 }
 0x576   :  { %v449_v40 = vsub.f32 0.0, %v448_v39 }
 0x578   :  { %v450_v41 = vmul.f32 1.442695, %v449_v40 }
 0x57a   :  { %528 = vpow2.f32 %v450_v41 }
 0x584   :  { %v529_v42 = vpop.eup %528 }
 0x585   :  { %v452_v43 = vadd.f32 1.0, %v529_v42 }
 0x587   :  { %530 = vrcp.f32 %v452_v43 }
 0x591   :  { %v531_v44 = vpop.eup %530 }
 0x592   :  { %v454_v45 = vmul.f32 %v531_v44, %v448_v39 }
 0x594   :  { %v455_v46 = vsel %vm651_vm9, %v454_v45, 0.0 }
 0x595   :  { %456 = vst [vmem:[%s675_s8] sm:$0x1] %v455_v46 }
 0x596   :  { %461 = vsyncpa [#allocation4], 1 }

</bundles_post_ra>
